<compile_context>
chip_gen: v6e
topology: v6e:2x2x1
jax: 0.10.0
libtpu: 0.0.40
codegen_flags: <defaults>
</compile_context>

<pallas_src>
import functools

import jax
import jax.numpy as jnp
from jax.experimental import pallas as pl
from jax.experimental.pallas import tpu as pltpu

_LANE = 128
_SUBLANE = 8


def _round_up(x, m):
    return (x + m - 1) // m * m


def _qtransformer_kernel(*refs):
    """out = [state | timestep] @ [W_tok ; W_time] + (b_tok + b_time).

    Activations arrive either pre-concatenated (1 ref, fallback path) or as
    two refs that are concatenated in VMEM (fast path; the concat boundary is
    lane-aligned so it is just vreg placement, negligible next to the dot).
    """
    *act_refs, w_ref, b_ref, out_ref = refs
    if len(act_refs) == 1:
        x = act_refs[0][...]
    else:
        x = jnp.concatenate([r[...] for r in act_refs], axis=-1)
    out_ref[...] = (
        jnp.dot(x, w_ref[...], preferred_element_type=jnp.float32) + b_ref[...]
    ).astype(out_ref.dtype)


@functools.partial(jax.jit, static_argnames=("tm", "vmem_budget_bytes"))
def qtransformer_forward(state, timestep, w_tok, b_tok, w_time, b_time,
                         *, tm=512, vmem_budget_bytes=16 * (1 << 20)):
    """state:    [B, S, state_dim]
       timestep: [B, S, max_seq_len]   (dense timestep encoding fed to the Linear)
       returns   state_emb + time_emb: [B, S, embed_dim]
    """
    B, S, Ks = state.shape
    Kt = timestep.shape[-1]
    E = w_tok.shape[-1]
    M = B * S
    K = Ks + Kt
    dtype = state.dtype
    itemsize = jnp.dtype(dtype).itemsize

    # --- fold the two Linears into one matmul + one bias (tiny, one-time) ---
    w = jnp.concatenate([w_tok, w_time], axis=0)       # [K, E]
    b = (b_tok + b_time).reshape(1, E)                  # [1, E]

    # --- pad embed dim to a multiple of 128 -> lane-dense output stores -----
    E_pad = _round_up(E, _LANE)
    if E_pad != E:
        w = jnp.pad(w, ((0, 0), (0, E_pad - E)))
        b = jnp.pad(b, ((0, 0), (0, E_pad - E)))

    s2 = state.reshape(M, Ks)
    t2 = timestep.reshape(M, Kt)

    # In-kernel concat only when the state/timestep boundary is lane-aligned;
    # otherwise use the (previously validated) wrapper-side concat.
    fuse_in_kernel = (Ks % _LANE == 0)

    # --- derive row tile from a conservative VMEM budget ---------------------
    weight_bytes = 2 * (K + 1) * E_pad * 4                       # resident W + b
    per_row_bytes = 2 * (K + E_pad) * max(itemsize, 4) + (K + E_pad) * 4
    tm_cap = max(_SUBLANE, (vmem_budget_bytes - weight_bytes) // per_row_bytes)
    tm_eff = min(tm, tm_cap, _round_up(M, _SUBLANE))
    tm_eff = max(_SUBLANE, (tm_eff // _SUBLANE) * _SUBLANE)

    # --- pad rows so the grid divides evenly (usually a no-op) --------------
    M_pad = _round_up(M, tm_eff)

    if fuse_in_kernel:
        if M_pad != M:
            s2 = jnp.pad(s2, ((0, M_pad - M), (0, 0)))
            t2 = jnp.pad(t2, ((0, M_pad - M), (0, 0)))
        operands = [s2, t2]
        act_specs = [pl.BlockSpec((tm_eff, Ks), lambda i: (i, 0)),
                     pl.BlockSpec((tm_eff, Kt), lambda i: (i, 0))]
    else:
        x = jnp.concatenate([s2, t2], axis=-1)           # [M, K]
        if M_pad != M:
            x = jnp.pad(x, ((0, M_pad - M), (0, 0)))
        operands = [x]
        act_specs = [pl.BlockSpec((tm_eff, K), lambda i: (i, 0))]

    grid = (M_pad // tm_eff,)

    cost = pl.CostEstimate(
        flops=2 * M_pad * K * E_pad,
        transcendentals=0,
        bytes_accessed=(M_pad * K * itemsize            # activations in
                        + (K + 1) * E_pad * 4           # weights + bias
                        + M_pad * E_pad * itemsize),    # output
    )

    out = pl.pallas_call(
        _qtransformer_kernel,
        out_shape=jax.ShapeDtypeStruct((M_pad, E_pad), dtype),
        grid_spec=pltpu.PrefetchScalarGridSpec(
            num_scalar_prefetch=0,
            grid=grid,
            in_specs=act_specs + [
                pl.BlockSpec((K, E_pad), lambda i: (0, 0)),   # fused weights (resident)
                pl.BlockSpec((1, E_pad), lambda i: (0, 0)),   # fused bias (resident)
            ],
            out_specs=pl.BlockSpec((tm_eff, E_pad), lambda i: (i, 0)),
        ),
        compiler_params=pltpu.CompilerParams(
            dimension_semantics=("parallel",),
            vmem_limit_bytes=32 * 1024 * 1024),
        cost_estimate=cost,
    )(*operands, w, b)

    return out[:M, :E].reshape(B, S, E)


def _reference_forward(state, timestep, w_tok, b_tok, w_time, b_time):
    state_emb = jnp.einsum("bsd,de->bse", state, w_tok) + b_tok
    time_emb = jnp.einsum("bst,te->bse", timestep, w_time) + b_time
    return state_emb + time_emb


if __name__ == "__main__":
    # Small, forward-consistent shapes.
    batch = 2
    seq = 8
    state_dim = 128       # QTransformer(state_dim=...)  (lane-aligned fast path)
    max_seq_len = 24      # args.max_seq_lenght (shrunk)
    embed_dim = 256       # args.embed_dim (shrunk)

    key = jax.random.PRNGKey(0)
    k_state, k_time, k_wt, k_bt, k_wtm, k_btm = jax.random.split(key, 6)

    state = jax.random.normal(k_state, (batch, seq, state_dim), jnp.float32)
    timestep = jax.random.normal(k_time, (batch, seq, max_seq_len), jnp.float32)

    # Deterministic parameter init (Linear weights stored as [in, out]).
    w_tok = jax.random.normal(k_wt, (state_dim, embed_dim), jnp.float32) * 0.02
    b_tok = jax.random.normal(k_bt, (embed_dim,), jnp.float32) * 0.02
    w_time = jax.random.normal(k_wtm, (max_seq_len, embed_dim), jnp.float32) * 0.02
    b_time = jax.random.normal(k_btm, (embed_dim,), jnp.float32) * 0.02

    out = qtransformer_forward(state, timestep, w_tok, b_tok, w_time, b_time)
    jax.block_until_ready(out)

    ref = _reference_forward(state, timestep, w_tok, b_tok, w_time, b_time)
    assert out.shape == (batch, seq, embed_dim)
    assert jnp.allclose(out, ref, atol=2e-3, rtol=2e-3), \
        float(jnp.max(jnp.abs(out - ref)))

    print("KERNEL_OK")
</pallas_src>

<mosaic_0001>
module attributes {stable_mosaic.version = 11 : i64} {
  func.func @_qtransformer_kernel(%arg0: i32, %arg1: memref<16x128xf32, #tpu.memory_space<vmem>>, %arg2: memref<16x24xf32, #tpu.memory_space<vmem>>, %arg3: memref<152x256xf32, #tpu.memory_space<vmem>>, %arg4: memref<1x256xf32, #tpu.memory_space<vmem>>, %arg5: memref<16x256xf32, #tpu.memory_space<vmem>>) attributes {dimension_semantics = [#tpu.dimension_semantics<parallel>], iteration_bounds = array<i64: 1>, scalar_prefetch = 0 : i64, scratch_operands = 0 : i64, tpu.core_type = #tpu.core_type<tc>, window_params = [{transform_indices = @transform_0, window_bounds = array<i64: 16, 128>}, {transform_indices = @transform_1, window_bounds = array<i64: 16, 24>}, {pipeline_mode = #tpu.pipeline_mode<synchronous>, transform_indices = @transform_2, window_bounds = array<i64: 152, 256>}, {pipeline_mode = #tpu.pipeline_mode<synchronous>, transform_indices = @transform_3, window_bounds = array<i64: 1, 256>}, {transform_indices = @transform_4, window_bounds = array<i64: 16, 256>}]} {
    %c0 = arith.constant 0 : index
    %c0_0 = arith.constant 0 : index
    %0 = vector.load %arg1[%c0, %c0_0] : memref<16x128xf32, #tpu.memory_space<vmem>>, vector<16x128xf32>
    %c0_1 = arith.constant 0 : index
    %c0_2 = arith.constant 0 : index
    %1 = vector.load %arg2[%c0_1, %c0_2] : memref<16x24xf32, #tpu.memory_space<vmem>>, vector<16x24xf32>
    %2 = tpu.concatenate %0, %1 in 1 : vector<16x128xf32>, vector<16x24xf32> -> vector<16x152xf32>
    %c0_3 = arith.constant 0 : index
    %c0_4 = arith.constant 0 : index
    %3 = vector.load %arg3[%c0_3, %c0_4] : memref<152x256xf32, #tpu.memory_space<vmem>>, vector<152x256xf32>
    %cst = arith.constant dense<0.000000e+00> : vector<16x256xf32>
    %4 = tpu.matmul %2, %3, %cst {dimension_numbers = #tpu.dot_dimension_numbers<[1], [0], [0], [1], [0, 0, 1, 1], [], []>} : vector<16x152xf32>, vector<152x256xf32>, vector<16x256xf32> -> vector<16x256xf32>
    %c0_5 = arith.constant 0 : index
    %c0_6 = arith.constant 0 : index
    %5 = vector.load %arg4[%c0_5, %c0_6] : memref<1x256xf32, #tpu.memory_space<vmem>>, vector<1x256xf32>
    %6 = vector.broadcast %5 : vector<1x256xf32> to vector<16x256xf32>
    %7 = arith.addf %4, %6 : vector<16x256xf32>
    %c0_7 = arith.constant 0 : index
    %c0_8 = arith.constant 0 : index
    %8 = vector.load %arg5[%c0_7, %c0_8] : memref<16x256xf32, #tpu.memory_space<vmem>>, vector<16x256xf32>
    tpu.vector_store %arg5[%c0_7, %c0_8], %7 {strides = array<i32>} : memref<16x256xf32, #tpu.memory_space<vmem>>, vector<16x256xf32>,
    return
  }
  func.func @transform_0(%arg0: i32) -> (i32, i32) {
    %c0_i32 = arith.constant 0 : i32
    %c0_i32_0 = arith.constant 0 : i32
    return %arg0, %c0_i32 : i32, i32
  }
  func.func @transform_1(%arg0: i32) -> (i32, i32) {
    %c0_i32 = arith.constant 0 : i32
    %c0_i32_0 = arith.constant 0 : i32
    return %arg0, %c0_i32 : i32, i32
  }
  func.func @transform_2(%arg0: i32) -> (i32, i32) {
    %c0_i32 = arith.constant 0 : i32
    %c0_i32_0 = arith.constant 0 : i32
    %c0_i32_1 = arith.constant 0 : i32
    return %c0_i32, %c0_i32_0 : i32, i32
  }
  func.func @transform_3(%arg0: i32) -> (i32, i32) {
    %c0_i32 = arith.constant 0 : i32
    %c0_i32_0 = arith.constant 0 : i32
    %c0_i32_1 = arith.constant 0 : i32
    return %c0_i32, %c0_i32_0 : i32, i32
  }
  func.func @transform_4(%arg0: i32) -> (i32, i32) {
    %c0_i32 = arith.constant 0 : i32
    %c0_i32_0 = arith.constant 0 : i32
    return %arg0, %c0_i32 : i32, i32
  }
}

</mosaic_0001>

<bundles_post_ra>
// kernel: qtransformer_forward.1
= control target key start
LH: loop header
LB: loop body
LE: loop exit
PB: predicated region body
PF: predicated region fallthrough
CT: control target
= control target key end

     0   :  { %s401_s0 = inlined_call_operand.vmem [shape: f32[16,128], index: 0, kind: input, shape index: {}]   ;;  %s402_s1 = inlined_call_operand.vmem [shape: f32[16,24], index: 1, kind: input, shape index: {}]   ;;  %s403_s2 = inlined_call_operand.vmem [shape: f32[152,256], index: 2, kind: input, shape index: {}]   ;;  %s404_s3 = inlined_call_operand.vmem [shape: f32[1,256], index: 3, kind: input, shape index: {}]   ;;  %s405_s4 = inlined_call_operand.hbm [shape: f32[16,256], index: 4, kind: output, shape index: {}]  }
   0x1   :  { %v53_v0 = vld [vmem:[%s403_s2 + $0xf8] sm:$0xff]  ;;  %v52_v1 = vld [vmem:[%s403_s2 + $0xf0] sm:$0xff]  ;;  %v51_v2 = vld [vmem:[%s403_s2 + $0xe8] sm:$0xff] }
   0x2   :  { %79 = vmatprep.subr.mxu0 %v53_v0  ;;  %178 = vmatprep.subr.mxu1 %v53_v0  ;;  %v50_v3 = vld [vmem:[%s403_s2 + $0xe0] sm:$0xff]  ;;  %v49_v4 = vld [vmem:[%s403_s2 + $0xd8] sm:$0xff]  ;;  %v48_v5 = vld [vmem:[%s403_s2 + $0xd0] sm:$0xff] }
   0x3   :  { %80 = vmatpush1.msra.mxu0 %v52_v1  ;;  %197 = vmatpush1.msra.mxu1 %v52_v1  ;;  %v47_v6 = vld [vmem:[%s403_s2 + $0xc8] sm:$0xff]  ;;  %v46_v7 = vld [vmem:[%s403_s2 + $0xc0] sm:$0xff]  ;;  %v45_v8 = vld [vmem:[%s403_s2 + $0xb8] sm:$0xff] }
   0x4   :  { %81 = vmatprep.subr.mxu0 %v51_v2  ;;  %179 = vmatprep.subr.mxu1 %v51_v2  ;;  %v44_v9 = vld [vmem:[%s403_s2 + $0xb0] sm:$0xff]  ;;  %v43_v10 = vld [vmem:[%s403_s2 + $0xa8] sm:$0xff]  ;;  %v42_v11 = vld [vmem:[%s403_s2 + $0xa0] sm:$0xff] }
   0x5   :  { %82 = vmatpush1.msra.mxu0 %v50_v3  ;;  %198 = vmatpush1.msra.mxu1 %v50_v3  ;;  %v41_v12 = vld [vmem:[%s403_s2 + $0x98] sm:$0xff]  ;;  %v40_v13 = vld [vmem:[%s403_s2 + $0x90] sm:$0xff]  ;;  %v39_v14 = vld [vmem:[%s403_s2 + $0x88] sm:$0xff] }
   0x6   :  { %83 = vmatprep.subr.mxu0 %v49_v4  ;;  %180 = vmatprep.subr.mxu1 %v49_v4  ;;  %v38_v15 = vld [vmem:[%s403_s2 + $0x80] sm:$0xff]  ;;  %v37_v16 = vld [vmem:[%s403_s2 + $0x78] sm:$0xff] }
   0x7   :  { %84 = vmatpush1.msra.mxu0 %v48_v5  ;;  %199 = vmatpush1.msra.mxu1 %v48_v5 }
   0x8   :  { %85 = vmatprep.subr.mxu0 %v47_v6  ;;  %181 = vmatprep.subr.mxu1 %v47_v6 }
   0x9   :  { %86 = vmatpush1.msra.mxu0 %v46_v7  ;;  %200 = vmatpush1.msra.mxu1 %v46_v7 }
   0xa   :  { %87 = vmatprep.subr.mxu0 %v45_v8  ;;  %182 = vmatprep.subr.mxu1 %v45_v8 }
   0xb   :  { %88 = vmatpush1.msra.mxu0 %v44_v9  ;;  %201 = vmatpush1.msra.mxu1 %v44_v9 }
   0xc   :  { %89 = vmatprep.subr.mxu0 %v43_v10  ;;  %183 = vmatprep.subr.mxu1 %v43_v10 }
   0xd   :  { %90 = vmatpush1.msra.mxu0 %v42_v11  ;;  %202 = vmatpush1.msra.mxu1 %v42_v11 }
   0xe   :  { %91 = vmatprep.subr.mxu0 %v41_v12  ;;  %184 = vmatprep.subr.mxu1 %v41_v12 }
   0xf   :  { %92 = vmatpush1.msra.mxu0 %v40_v13  ;;  %203 = vmatpush1.msra.mxu1 %v40_v13 }
  0x10   :  { %9 = vsyncpa [#allocation3], 0  ;;  %93 = vmatprep.subr.mxu0 %v39_v14  ;;  %185 = vmatprep.subr.mxu1 %v39_v14  ;;  %v36_v17 = vld [vmem:[%s403_s2 + $0x70] sm:$0xff]  ;;  %v35_v18 = vld [vmem:[%s403_s2 + $0x68] sm:$0xff]  ;;  %vm72_vm0 = vcmask 195584   ;;  %v62_v42 = vlaneseq  ;;  %s241_s21 = smov [#allocation2]  }
  0x11   :  { %94 = vmatpush1.msra.mxu0 %v38_v15  ;;  %204 = vmatpush1.msra.mxu1 %v38_v15  ;;  %v34_v19 = vld [vmem:[%s403_s2 + $0x60] sm:$0xff]  ;;  %v33_v20 = vld [vmem:[%s403_s2 + $0x58] sm:$0xff]  ;;  %v32_v21 = vld [vmem:[%s403_s2 + $0x50] sm:$0xff]  ;;  %s165_s22 = sshll.u32 %s241_s21, 4  ;;  %s166_s22 = int_to_ptr.vmem [resolvable:$true] %s165_s22 }
  0x12   :  { %95 = vmatprep.subr.mxu0 %v37_v16  ;;  %186 = vmatprep.subr.mxu1 %v37_v16  ;;  %v31_v22 = vld [vmem:[%s403_s2 + $0x48] sm:$0xff]  ;;  %v30_v23 = vld [vmem:[%s403_s2 + $0x40] sm:$0xff]  ;;  %v29_v24 = vld [vmem:[%s403_s2 + $0x38] sm:$0xff]  ;;  %v63_v43 = vshrl.u32 %v62_v42, 7  ;;  %p224_p1 = scmp.lt.s32.totalorder %s166_s22, %s166_s22 }
  0x13   :  { %96 = vmatpush1.msra.mxu0 %v36_v17  ;;  %205 = vmatpush1.msra.mxu1 %v36_v17  ;;  %v28_v25 = vld [vmem:[%s403_s2 + $0x30] sm:$0xff]  ;;  %v27_v26 = vld [vmem:[%s403_s2 + $0x28] sm:$0xff]  ;;  %v26_v27 = vld [vmem:[%s403_s2 + $0x20] sm:$0xff] }
  0x14   :  { %97 = vmatprep.subr.mxu0 %v35_v18  ;;  %187 = vmatprep.subr.mxu1 %v35_v18  ;;  %v25_v28 = vld [vmem:[%s403_s2 + $0x18] sm:$0xff]  ;;  %v24_v29 = vld [vmem:[%s403_s2 + $0x10] sm:$0xff]  ;;  %v23_v30 = vld [vmem:[%s403_s2 + $0x8] sm:$0xff]  ;;  %v64_v44 = vsub.s32 0, %v63_v43  ;;  %v68_v46 = vsub.s32 1, %v63_v43 }
  0x15   :  { %98 = vmatpush1.msra.mxu0 %v34_v19  ;;  %206 = vmatpush1.msra.mxu1 %v34_v19  ;;  %v22_v31 = vld [vmem:[%s403_s2] sm:$0xff]  ;;  %v59_v32 = vld [vmem:[%s403_s2 + $0x128] sm:$0xff]  ;;  %v57_v34 = vld [vmem:[%s403_s2 + $0x118] sm:$0xff] }
  0x16   :  { %99 = vmatprep.subr.mxu0 %v33_v20  ;;  %188 = vmatprep.subr.mxu1 %v33_v20  ;;  %v58_v33 = vld [vmem:[%s403_s2 + $0x120] sm:$0xff]  ;;  %v56_v35 = vld [vmem:[%s403_s2 + $0x110] sm:$0xff]  ;;  %v55_v36 = vld [vmem:[%s403_s2 + $0x108] sm:$0xff] }
  0x17   :  { %100 = vmatpush1.msra.mxu0 %v32_v21  ;;  %207 = vmatpush1.msra.mxu1 %v32_v21  ;;  %v54_v37 = vld [vmem:[%s403_s2 + $0x100] sm:$0xff]  ;;  %v21_v39 = vld [vmem:[%s402_s1 + $0x8] sm:$0xff] }
  0x18   :  { %101 = vmatprep.subr.mxu0 %v31_v22  ;;  %189 = vmatprep.subr.mxu1 %v31_v22  ;;  %v20_v38 = vld [vmem:[%s402_s1] sm:$0xff]  ;;  %v19_v41 = vld [vmem:[%s401_s0 + $0x8] sm:$0xff] }
  0x19   :  { %102 = vmatpush1.msra.mxu0 %v30_v23  ;;  %208 = vmatpush1.msra.mxu1 %v30_v23  ;;  %v18_v40 = vld [vmem:[%s401_s0] sm:$0xff]  ;;  %s219_s0 = scalar_lea.vmem %s166_s22, 512 }
  0x1a   :  { %103 = vmatprep.subr.mxu0 %v29_v24  ;;  %190 = vmatprep.subr.mxu1 %v29_v24  ;;  %v60_v45 = vld [vmem:[%s404_s3] sm:$0x3]  ;;  %p220_p0 = scmp.ne.s32.totalorder %s166_s22, %s219_s0  ;;  %p225_p2 = scmp.lt.s32.totalorder %s219_s0, %s219_s0 }
  0x1b   :  { %104 = vmatpush1.msra.mxu0 %v28_v25  ;;  %209 = vmatpush1.msra.mxu1 %v28_v25  ;;  %v65_v47 = vrot.slane %v60_v45, %v64_v44  ;;  %v69_v48 = vrot.slane %v60_v45, %v68_v46 }
  0x1c   :  { %105 = vmatprep.subr.mxu0 %v27_v26  ;;  %191 = vmatprep.subr.mxu1 %v27_v26  ;;  %p226_p3 = por %p225_p2, %p224_p1 }
  0x1d   :  { %106 = vmatpush1.msra.mxu0 %v26_v27  ;;  %210 = vmatpush1.msra.mxu1 %v26_v27 }
  0x1e   :  { %107 = vmatprep.subr.mxu0 %v25_v28  ;;  %192 = vmatprep.subr.mxu1 %v25_v28  ;;  %p227_p4 = pnand %p226_p3, %p220_p0 }
  0x1f   :  { %108 = vmatpush1.msra.mxu0 %v24_v29  ;;  %211 = vmatpush1.msra.mxu1 %v24_v29 }
  0x20   :  { %109 = vmatprep.subr.mxu0 %v23_v30  ;;  %193 = vmatprep.subr.mxu1 %v23_v30 }
  0x21   :  { %110 = vmatpush1.msra.mxu0 %v22_v31  ;;  %212 = vmatpush1.msra.mxu1 %v22_v31 }
  0x22   :  { %137 = vmatprep.subr.mxu0 %v59_v32  ;;  %194 = vmatprep.subr.mxu1 %v59_v32 }
  0x23   :  { %138 = vmatpush2.msra.mxu0 %v58_v33  ;;  %213 = vmatpush2.msra.mxu1 %v58_v33 }
  0x24   :  { %139 = vmatprep.subr.mxu0 %v57_v34  ;;  %195 = vmatprep.subr.mxu1 %v57_v34 }
  0x25   :  { %140 = vmatpush2.msra.mxu0 %v56_v35  ;;  %214 = vmatpush2.msra.mxu1 %v56_v35 }
  0x26   :  { %141 = vmatprep.subr.mxu0 %v55_v36  ;;  %196 = vmatprep.subr.mxu1 %v55_v36 }
  0x27   :  { %142 = vmatpush2.msra.mxu0 %v54_v37  ;;  %215 = vmatpush2.msra.mxu1 %v54_v37 }
  0x28   :  { %176 = vmatprep.mubr.msk.f32.mxu0 %vm72_vm0, %v20_v38  ;;  %177 = vmatprep.mubr.msk.f32.mxu1 %vm72_vm0, %v21_v39 }
  0x29   :  { %144 = vmatmul.mubr.f32.vlgmr.msra.gmra.mxu0 %v18_v40  ;;  %150 = vmatmul.mubr.f32.vlgmr.msra.gmra.mxu1 %v19_v41 }
  0xe9   :  { %v145_v49 = vpop.f32.mrf.mxu0  ;;  %v151_v50 = vpop.f32.mrf.mxu1 }
  0xea   :  { %v146_v51 = vadd.f32 %v145_v49, %v65_v47  ;;  %v152_v52 = vadd.f32 %v151_v50, %v65_v47 }
  0xeb   :  { %v147_v53 = vpop.f32.mrf.mxu0  ;;  %v153_v54 = vpop.f32.mrf.mxu1 }
  0xec   :  { %156 = vst [vmem:[#allocation2] sm:$0xff] %v146_v51  ;;  %158 = vst [vmem:[#allocation2 + $0x10] sm:$0xff] %v152_v52  ;;  %v148_v55 = vadd.f32 %v147_v53, %v69_v48  ;;  %v154_v56 = vadd.f32 %v153_v54, %v69_v48 }
  0xee   :  { %157 = vst [vmem:[#allocation2 + $0x8] sm:$0xff] %v148_v55  ;;  %159 = vst [vmem:[#allocation2 + $0x18] sm:$0xff] %v154_v56 }
  0xef   :  { %230 = shalt.err (!%p227_p4)
}
  0xf0   :  { %s242_s3 = smov 256   ;;  %s243_s23 = smov 16  }
  0xf1   :  { %171 = dma.vmem_to_hbm [thread:$0]  %s166_s22, 512, %s405_s4, [#allocation3], %s242_s3, %s242_s3, %s243_s23  }
  0xf2   :  { %239 = dma.done.wait [#allocation3], 512  }
  0xf3   :  { %240 = vsyncadd [#allocation3], 4294966784 }
  0xf4   :  { %175 = vsyncpa [#allocation3], 1 }

</bundles_post_ra>
